<compile_context>
chip_gen: v5e
topology: v5e:2x2
jax: 0.10.0
libtpu: 0.0.40
codegen_flags: <defaults>
</compile_context>

<pallas_src>
import functools

import jax
import jax.numpy as jnp
from jax.experimental import pallas as pl
from jax.experimental.pallas import tpu as pltpu

LANE = 128
SUB = 8


def _focal_kernel(x_ref, lbl_ref, out_ref, *, gamma):
    # x_ref:   (1, C, S_TILE, 128) logits (native dtype)
    # lbl_ref: (1, S_TILE, 128) int32 labels, -1 marks padded voxels
    # out_ref: (1, 8, 128) f32 partial sums, resident across the spatial axis
    s = pl.program_id(1)

    @pl.when(s == 0)
    def _():
        out_ref[...] = jnp.zeros_like(out_ref)

    x = x_ref[0].astype(jnp.float32)            # (C, S_TILE, 128)
    labels = lbl_ref[0]                         # (S_TILE, 128) int32

    # Numerically-stable softmax pieces over the leading class axis:
    # C-way VPU max/add over (S_TILE, 128) slabs -- no sublane padding, no XLU.
    m = jnp.max(x, axis=0)                      # (S_TILE, 128)
    xm = x - m[None]                            # (C, S_TILE, 128)
    e = jnp.exp(xm)                             # C exps / voxel (EUP slot)
    ssum = jnp.sum(e, axis=0)                   # (S_TILE, 128)

    # Target-class gather via boolean one-hot mask + where/sum (pure VPU).
    iota_c = jax.lax.broadcasted_iota(jnp.int32, x.shape, 0)
    onehot = iota_c == labels[None]             # (C, S_TILE, 128) bool
    xm_t = jnp.sum(jnp.where(onehot, xm, 0.0), axis=0)   # (S_TILE, 128)
    e_t = jnp.sum(jnp.where(onehot, e, 0.0), axis=0)

    logpt = xm_t - jnp.log(ssum)                # log softmax prob of target
    pt = e_t * pl.reciprocal(ssum)              # one reciprocal, no divides
    focal = -((1.0 - pt) ** gamma) * logpt      # int gamma -> unrolled muls

    # Mask out padded voxels (label == -1).
    focal = jnp.where(labels >= 0, focal, 0.0)

    # Fold (S_TILE, 128) into one vreg of partial sums (pure VPU adds, the
    # reshape only regroups the sublane axis so it stays layout-friendly).
    partial = jnp.sum(focal.reshape(-1, SUB, LANE), axis=0)   # (8, 128)
    out_ref[...] += partial[None]


def focal_loss(inputs, targets, gamma=2, *, s_tile_cap=1024):
    """inputs: (N, C, *spatial) float logits; targets: (N, *spatial) int labels."""
    N, C = inputs.shape[0], inputs.shape[1]
    V = 1
    for d in inputs.shape[2:]:
        V *= d

    x = inputs.reshape(N, C, V)                 # keep native dtype (cast in-kernel)
    lbl = targets.reshape(N, V).astype(jnp.int32)

    # Spatial voxels -> (rows, 128) lanes; tile rows along an "arbitrary"
    # reduction grid axis so VMEM stays bounded for real volumetric sizes.
    s_rows = -(-V // LANE)
    s_tile = min(s_tile_cap, ((s_rows + SUB - 1) // SUB) * SUB)
    s_pad = ((s_rows + s_tile - 1) // s_tile) * s_tile
    v_pad = s_pad * LANE

    if v_pad != V:
        x = jnp.pad(x, ((0, 0), (0, 0), (0, v_pad - V)))
        lbl = jnp.pad(lbl, ((0, 0), (0, v_pad - V)), constant_values=-1)

    x = x.reshape(N, C, s_pad, LANE)
    lbl = lbl.reshape(N, s_pad, LANE)

    grid = (N, s_pad // s_tile)

    cost = pl.CostEstimate(
        flops=N * v_pad * (6 * C + 12),
        transcendentals=N * v_pad * (C + 2),
        bytes_accessed=(x.size * x.dtype.itemsize + lbl.size * 4
                        + N * SUB * LANE * 4),
    )

    out = pl.pallas_call(
        functools.partial(_focal_kernel, gamma=gamma),
        out_shape=jax.ShapeDtypeStruct((N, SUB, LANE), jnp.float32),
        grid_spec=pltpu.PrefetchScalarGridSpec(
            num_scalar_prefetch=0,
            grid=grid,
            in_specs=[
                pl.BlockSpec((1, C, s_tile, LANE), lambda n, s: (n, 0, s, 0)),
                pl.BlockSpec((1, s_tile, LANE), lambda n, s: (n, s, 0)),
            ],
            out_specs=pl.BlockSpec((1, SUB, LANE), lambda n, s: (n, 0, 0)),
        ),
        compiler_params=pltpu.CompilerParams(
            dimension_semantics=("parallel", "arbitrary")),
        cost_estimate=cost,
    )(x, lbl)

    # Mean over all N * V voxels, matching CrossEntropyLoss(reduction='none').mean()
    return jnp.sum(out) / (N * V)


if __name__ == "__main__":
    key = jax.random.PRNGKey(0)
    k1, k2 = jax.random.split(key)
    N, C, X, Y, Z = 2, 4, 8, 8, 8            # 5-D volumetric logits per the module
    inputs = jax.random.normal(k1, (N, C, X, Y, Z), dtype=jnp.float32)
    targets = jax.random.randint(k2, (N, X, Y, Z), 0, C, dtype=jnp.int32)

    loss = focal_loss(inputs, targets, gamma=2)
    jax.block_until_ready(loss)

    # plain-JAX reference of the PyTorch forward
    def ref_focal(x, t, gamma=2):
        logp = jax.nn.log_softmax(x.astype(jnp.float32), axis=1)
        oh = jax.nn.one_hot(t, x.shape[1], axis=1, dtype=jnp.float32)
        logpt = jnp.sum(oh * logp, axis=1)
        pt = jnp.exp(logpt)
        return jnp.mean(-((1.0 - pt) ** gamma) * logpt)

    ref = ref_focal(inputs, targets, 2)
    assert jnp.allclose(loss, ref, atol=1e-5, rtol=1e-5), (loss, ref)
    print("KERNEL_OK")
</pallas_src>

<mosaic_0001>
module attributes {stable_mosaic.version = 11 : i64} {
  func.func @_focal_kernel(%arg0: i32, %arg1: i32, %arg2: memref<1x4x8x128xf32, #tpu.memory_space<vmem>>, %arg3: memref<1x8x128xi32, #tpu.memory_space<vmem>>, %arg4: memref<1x8x128xf32, #tpu.memory_space<vmem>>) attributes {dimension_semantics = [#tpu.dimension_semantics<parallel>, #tpu.dimension_semantics<arbitrary>], iteration_bounds = array<i64: 2, 1>, scalar_prefetch = 0 : i64, scratch_operands = 0 : i64, tpu.core_type = #tpu.core_type<tc>, window_params = [{transform_indices = @transform_0, window_bounds = array<i64: 1, 4, 8, 128>}, {transform_indices = @transform_1, window_bounds = array<i64: 1, 8, 128>}, {transform_indices = @transform_2, window_bounds = array<i64: 1, 8, 128>}]} {
    %c0_i32 = arith.constant 0 : i32
    %0 = arith.cmpi eq, %arg1, %c0_i32 : i32
    %1 = arith.extui %0 : i1 to i32
    %c0_i32_0 = arith.constant 0 : i32
    %2 = arith.cmpi ne, %1, %c0_i32_0 : i32
    scf.if %2 {
      %cst_23 = arith.constant 0.000000e+00 : f32
      %43 = vector.broadcast %cst_23 : f32 to vector<1x8x128xf32>
      %c0_24 = arith.constant 0 : index
      %c0_25 = arith.constant 0 : index
      %c0_26 = arith.constant 0 : index
      %44 = vector.load %arg4[%c0_24, %c0_25, %c0_26] : memref<1x8x128xf32, #tpu.memory_space<vmem>>, vector<1x8x128xf32>
      tpu.vector_store %arg4[%c0_24, %c0_25, %c0_26], %43 {strides = array<i32>} : memref<1x8x128xf32, #tpu.memory_space<vmem>>, vector<1x8x128xf32>,
    } else {
    }
    %c0 = arith.constant 0 : index
    %c0_1 = arith.constant 0 : index
    %c0_2 = arith.constant 0 : index
    %c0_3 = arith.constant 0 : index
    %3 = vector.load %arg2[%c0, %c0_1, %c0_2, %c0_3] : memref<1x4x8x128xf32, #tpu.memory_space<vmem>>, vector<1x4x8x128xf32>
    %4 = vector.shape_cast %3 : vector<1x4x8x128xf32> to vector<4x8x128xf32>
    %c0_4 = arith.constant 0 : index
    %c0_5 = arith.constant 0 : index
    %c0_6 = arith.constant 0 : index
    %5 = vector.load %arg3[%c0_4, %c0_5, %c0_6] : memref<1x8x128xi32, #tpu.memory_space<vmem>>, vector<1x8x128xi32>
    %6 = vector.shape_cast %5 : vector<1x8x128xi32> to vector<8x128xi32>
    %cst = arith.constant dense<0xFF800000> : vector<8x128xf32>
    %7 = vector.multi_reduction <maximumf>, %4, %cst [0] : vector<4x8x128xf32> to vector<8x128xf32>
    %8 = vector.shape_cast %7 : vector<8x128xf32> to vector<1x8x128xf32>
    %9 = vector.broadcast %8 : vector<1x8x128xf32> to vector<4x8x128xf32>
    %10 = arith.subf %4, %9 : vector<4x8x128xf32>
    %11 = math.exp %10 : vector<4x8x128xf32>
    %cst_7 = arith.constant dense<0.000000e+00> : vector<8x128xf32>
    %12 = vector.multi_reduction <add>, %11, %cst_7 [0] : vector<4x8x128xf32> to vector<8x128xf32>
    %13 = tpu.iota {dimensions = array<i32: 0>} : vector<4x8x128xi32>
    %14 = vector.shape_cast %6 : vector<8x128xi32> to vector<1x8x128xi32>
    %15 = vector.broadcast %14 : vector<1x8x128xi32> to vector<4x8x128xi32>
    %16 = arith.cmpi eq, %13, %15 : vector<4x8x128xi32>
    %cst_8 = arith.constant 0.000000e+00 : f32
    %17 = vector.broadcast %cst_8 : f32 to vector<4x8x128xf32>
    %18 = arith.select %16, %10, %17 : vector<4x8x128xi1>, vector<4x8x128xf32>
    %cst_9 = arith.constant dense<0.000000e+00> : vector<8x128xf32>
    %19 = vector.multi_reduction <add>, %18, %cst_9 [0] : vector<4x8x128xf32> to vector<8x128xf32>
    %cst_10 = arith.constant 0.000000e+00 : f32
    %20 = vector.broadcast %cst_10 : f32 to vector<4x8x128xf32>
    %21 = arith.select %16, %11, %20 : vector<4x8x128xi1>, vector<4x8x128xf32>
    %cst_11 = arith.constant dense<0.000000e+00> : vector<8x128xf32>
    %22 = vector.multi_reduction <add>, %21, %cst_11 [0] : vector<4x8x128xf32> to vector<8x128xf32>
    %23 = math.log %12 : vector<8x128xf32>
    %24 = arith.subf %19, %23 : vector<8x128xf32>
    %25 = tpu.reciprocal %12 : vector<8x128xf32> -> vector<8x128xf32>
    %26 = arith.mulf %22, %25 : vector<8x128xf32>
    %cst_12 = arith.constant 1.000000e+00 : f32
    %27 = vector.broadcast %cst_12 : f32 to vector<8x128xf32>
    %28 = arith.subf %27, %26 : vector<8x128xf32>
    %29 = arith.mulf %28, %28 : vector<8x128xf32>
    %cst_13 = arith.constant 0.000000e+00 : f32
    %30 = vector.broadcast %cst_13 : f32 to vector<8x128xf32>
    %31 = arith.subf %30, %29 : vector<8x128xf32>
    %32 = arith.mulf %31, %24 : vector<8x128xf32>
    %c0_i32_14 = arith.constant 0 : i32
    %33 = vector.broadcast %c0_i32_14 : i32 to vector<8x128xi32>
    %34 = arith.cmpi sge, %6, %33 : vector<8x128xi32>
    %cst_15 = arith.constant 0.000000e+00 : f32
    %35 = vector.broadcast %cst_15 : f32 to vector<8x128xf32>
    %36 = arith.select %34, %32, %35 : vector<8x128xi1>, vector<8x128xf32>
    %37 = vector.shape_cast %36 : vector<8x128xf32> to vector<1x8x128xf32>
    %cst_16 = arith.constant dense<0.000000e+00> : vector<8x128xf32>
    %38 = vector.multi_reduction <add>, %37, %cst_16 [0] : vector<1x8x128xf32> to vector<8x128xf32>
    %c0_17 = arith.constant 0 : index
    %c0_18 = arith.constant 0 : index
    %c0_19 = arith.constant 0 : index
    %39 = vector.load %arg4[%c0_17, %c0_18, %c0_19] : memref<1x8x128xf32, #tpu.memory_space<vmem>>, vector<1x8x128xf32>
    %40 = vector.shape_cast %38 : vector<8x128xf32> to vector<1x8x128xf32>
    %41 = arith.addf %39, %40 : vector<1x8x128xf32>
    %c0_20 = arith.constant 0 : index
    %c0_21 = arith.constant 0 : index
    %c0_22 = arith.constant 0 : index
    %42 = vector.load %arg4[%c0_20, %c0_21, %c0_22] : memref<1x8x128xf32, #tpu.memory_space<vmem>>, vector<1x8x128xf32>
    tpu.vector_store %arg4[%c0_20, %c0_21, %c0_22], %41 {strides = array<i32>} : memref<1x8x128xf32, #tpu.memory_space<vmem>>, vector<1x8x128xf32>,
    return
  }
  func.func @transform_0(%arg0: i32, %arg1: i32) -> (i32, i32, i32, i32) {
    %c0_i32 = arith.constant 0 : i32
    %c0_i32_0 = arith.constant 0 : i32
    %c0_i32_1 = arith.constant 0 : i32
    return %arg0, %c0_i32, %arg1, %c0_i32_0 : i32, i32, i32, i32
  }
  func.func @transform_1(%arg0: i32, %arg1: i32) -> (i32, i32, i32) {
    %c0_i32 = arith.constant 0 : i32
    %c0_i32_0 = arith.constant 0 : i32
    return %arg0, %arg1, %c0_i32 : i32, i32, i32
  }
  func.func @transform_2(%arg0: i32, %arg1: i32) -> (i32, i32, i32) {
    %c0_i32 = arith.constant 0 : i32
    %c0_i32_0 = arith.constant 0 : i32
    %c0_i32_1 = arith.constant 0 : i32
    return %arg0, %c0_i32, %c0_i32_0 : i32, i32, i32
  }
}

</mosaic_0001>

<bundles_post_ra>
// kernel: tpu_custom_call.1
= control target key start
LH: loop header
LB: loop body
LE: loop exit
PB: predicated region body
PF: predicated region fallthrough
CT: control target
= control target key end

     0   :  { %7 = vsyncpa [#allocation3], 0  ;;  %s826_s0 = inlined_call_operand.hbm [shape: f32[2,4,8,128], index: 0, kind: input, shape index: {}]   ;;  %s827_s1 = inlined_call_operand.hbm [shape: s32[2,8,128], index: 1, kind: input, shape index: {}]   ;;  %s828_s2 = inlined_call_operand.hbm [shape: f32[2,8,128], index: 2, kind: output, shape index: {}]  }
   0x1   :  { %9 = vsyncpa [#allocation3 + $0x1], 0 }
   0x2   :  { %10 = vsyncpa [#allocation6], 0 }
   0x3   :  { %12 = vsyncpa [#allocation6 + $0x1], 0 }
   0x4   :  { %13 = vsyncpa [#allocation4], 0 }
   0x5   :  { %15 = vsyncpa [#allocation4 + $0x1], 0  ;;  %s680_s9 = smov 0   ;;  %s682_s10 = smov 0  }
   0x6   :  { %s684_s11 = smov 0   ;;  %s686_s12 = smov 0  }
   0x7   :  { %s688_s13 = smov 0   ;;  %s690_s14 = smov 0  }
   0x8 LB: > { %s415_s15 = sadd.s32 4294967295, %s661_s14   ;;  %s416_s16 = sadd.s32 4294967294, %s661_s14   ;;  %s661_s14 = sphi %s690_s14, %s21_s14   ;;  %s657_s13 = sphi %s688_s13, %s838_s13   ;;  %s653_s12 = sphi %s686_s12, %s837_s12   ;;  %s649_s11 = sphi %s684_s11, %s836_s11   ;;  %s645_s10 = sphi %s682_s10, %s835_s10   ;;  %s641_s9 = sphi %s680_s9, %s834_s9  }
   0x9   : > { %s33_s17 = sadd.s32 1, %s657_s13  ;;  %s42_s18 = sadd.s32 1, %s649_s11 }
   0xa   : > { %p35_p0 = scmp.ge.s32.totalorder %s33_s17, 2  ;;  %p49_p1 = scmp.ne.s32.totalorder %s649_s11, %s645_s10 }
   0xb   : > { %p50_p2 = scmp.eq.s32.totalorder %s661_s14, 0  ;;  %p55_p3 = scmp.ne.s32.totalorder %s645_s10, %s641_s9 }
   0xc   : > { %s840_s17 = smov (%p35_p0, %s33_s17), 0  ;;  %p56_p5 = scmp.eq.s32.totalorder %s415_s15, 0 }
   0xd   : > { %p721_p4 = por %p50_p2, %p49_p1  ;;  %s37_s20 = ssub.s32 %s657_s13, %s840_s17 }
   0xe   : > { %p107_p6 = scmp.eq.s32.totalorder %s415_s15, 1  ;;  %p40_p7 = scmp.eq.s32.totalorder %s37_s20, 0 }
   0xf   : > { %p727_p8 = por %p56_p5, %p55_p3  ;;  %p113_p10 = scmp.eq.s32.totalorder %s416_s16, 1 }
  0x10   : > { %p731_p9 = por %p107_p6, %p49_p1  ;;  %p418_p12 = scmp.ge.s32.totalorder %s661_s14, 2 }
  0x11   : > { %s736_s23 = scalar_select %p40_p7, %s649_s11, %s42_s18  }
  0x12   : > { %p738_p11 = por %p113_p10, %p55_p3  ;;  %p450_p13 = scmp.lt.s32.totalorder %s661_s14, 2 }
  0x13   : > { %s133_s25 = sand.u32 1, %s649_s11   ;;  %s432_s27 = sshll.u32 %s657_s13, 5 }
  0x14   : > { %s419_s26 = sshll.u32 %s133_s25, 5  ;;  %s143_s30 = scalar_lea.hbm %s826_s0, %s432_s27 }
  0x15   : > { %s137_s3 = scalar_lea.vmem [#allocation2], %s419_s26  ;;  %s144_s5 = sshll.u32 %s143_s30, 4  ;;  %s145_s5 = int_to_ptr.hbm [resolvable:$true] %s144_s5 }
  0x16   : > { %s146_s4 = sshll.u32 %s137_s3, 4  ;;  %p751_p0 = pnand %p450_p13, %p721_p4  ;;  %s147_s4 = int_to_ptr.vmem [resolvable:$true] %s146_s4 }
  0x17   : > { %p424_p1 = scmp.ge.s32.totalorder %s661_s14, 1  ;;  %s134_s7 = scalar_lea.sflag [#allocation3], %s133_s25 }
  0x18   : > { %s663_s8 = smov 128   ;;  %s664_s15 = smov 8  }
  0x19   : > { %442 = dma.hbm_to_vmem [thread:$0]  (!%p751_p0), %s145_s5, 512, %s147_s4, %s134_s7, %s663_s8, %s663_s8, %s664_s15  }
  0x1a   : > { %p174_p2 = scmp.lt.s32.totalorder %s661_s14, 3  ;;  %s422_s16 = sshll.u32 %s133_s25, 3 }
  0x1b   : > { %s423_s18 = sshll.u32 %s657_s13, 3  ;;  %s160_s27 = scalar_lea.vmem [#allocation5], %s422_s16 }
  0x1c   : > { %p175_p3 = pnand %p424_p1, %p174_p2  ;;  %s165_s19 = scalar_lea.hbm %s827_s1, %s423_s18 }
  0x1d   : > { %s169_s28 = sshll.u32 %s160_s27, 4  ;;  %s167_s29 = sshll.u32 %s165_s19, 4  ;;  %s170_s28 = int_to_ptr.vmem [resolvable:$true] %s169_s28  ;;  %s168_s29 = int_to_ptr.hbm [resolvable:$true] %s167_s29 }
  0x1e   : > { %s157_s30 = scalar_lea.sflag [#allocation6], %s133_s25  ;;  %178 = sbr.rel (%p175_p3) target bundleno = 94 (0x5e), region = 28 }
  0x1f   : > { %445 = dma.hbm_to_vmem [thread:$0]  (!%p751_p0), %s168_s29, 128, %s170_s28, %s157_s30  }
  0x20   : > { %s766_s3 = sand.u32 (!%p175_p3), 1, %s645_s10  }
  0x21   : > { %s425_s4 = sshll.u32 (!%p175_p3), %s766_s3, 5  ;;  %s181_s5 = scalar_lea.sflag (!%p175_p3), [#allocation3], %s766_s3 }
  0x22   : > { %s184_s7 = scalar_lea.vmem (!%p175_p3), [#allocation2], %s425_s4 }
  0x23   : > { %628 = dma.done.wait (%p727_p8), %s181_s5, 512  }
  0x24   : > { %630 = vsyncadd (%p727_p8), %s181_s5, 4294966784  ;;  %s426_s25 = sshll.u32 %s766_s3, 3  ;;  %s191_s6 = scalar_lea.sflag [#allocation6], %s766_s3 }
  0x25   : > { %s194_s8 = scalar_lea.vmem [#allocation5], %s426_s25 }
  0x26   : > { %632 = dma.done.wait (%p727_p8), %s191_s6, 128  }
  0x27   : > { %634 = vsyncadd (%p727_p8), %s191_s6, 4294967168  ;;  %v226_v0 = vld [vmem:[%s184_s7] sm:$0xff]  ;;  %v227_v1 = vld [vmem:[%s184_s7 + $0x8] sm:$0xff]  ;;  %s429_s21 = sshll.u32 %s653_s12, 3  ;;  %s220_s20 = scalar_lea.vmem [#allocation7], %s426_s25 }
  0x28   : > { %v228_v2 = vld [vmem:[%s184_s7 + $0x10] sm:$0xff]  ;;  %v229_v3 = vld [vmem:[%s184_s7 + $0x18] sm:$0xff]  ;;  %v231_v4 = vmax.f32 %v226_v0, %v227_v1  ;;  %v230_v20 = vld [vmem:[%s194_s8] sm:$0xff]  ;;  %s306_s18 = scalar_lea.hbm %s828_s2, %s429_s21  ;;  %s308_s26 = sshll.u32 %s220_s20, 4  ;;  %s309_s26 = int_to_ptr.vmem [resolvable:$true] %s308_s26 }
  0x29   : > { %v232_v5 = vmax.f32 %v228_v2, %v229_v3  ;;  %vm249_vm0 = vcmp.eq.s32.totalorder %v230_v20, 0  ;;  %vm250_vm1 = vcmp.eq.s32.totalorder %v230_v20, 1  ;;  %vm251_vm2 = vcmp.eq.s32.totalorder %v230_v20, 2  ;;  %s310_s19 = sshll.u32 %s306_s18, 4  ;;  %s296_s27 = scalar_lea.sflag [#allocation4], %s766_s3  ;;  %s311_s19 = int_to_ptr.hbm [resolvable:$true] %s310_s19 }
  0x2a   : > { %vm252_vm3 = vcmp.eq.s32.totalorder %v230_v20, 3  ;;  %vm289_vm8 = vcmp.ge.s32.totalorder %v230_v20, 0  ;;  %s589_s12 = sshra.s32 %s311_s19, 4  ;;  %s595_s4 = scalar_lea.hbm %s828_s2, 16  ;;  %s590_s12 = int_to_ptr.hbm [resolvable:$true] %s589_s12 }
  0x2b   : > { %v233_v6 = vmax.f32 %v231_v4, %v232_v5  ;;  %s591_s28 = scalar_lea.hbm %s590_s12, 8  ;;  %p596_p7 = scmp.lt.s32.totalorder %s590_s12, %s828_s2 }
  0x2c   : > { %p592_p4 = scmp.ne.s32.totalorder %s590_s12, %s591_s28  ;;  %p597_p8 = scmp.lt.s32.totalorder %s595_s4, %s591_s28 }
  0x2d   : > { %v234_v7 = vsub.f32 %v226_v0, %v233_v6  ;;  %v235_v8 = vsub.f32 %v227_v1, %v233_v6  ;;  %v236_v9 = vsub.f32 %v228_v2, %v233_v6  ;;  %v237_v10 = vsub.f32 %v229_v3, %v233_v6 }
  0x2e   : > { %p593_p5 = pnand %p592_p4, %p731_p9  ;;  %p598_p10 = por %p597_p8, %p596_p7 }
  0x2f   : > { %v238_v11 = vmul.f32 1.442695, %v234_v7  ;;  %v240_v12 = vmul.f32 1.442695, %v235_v8  ;;  %v242_v13 = vmul.f32 1.442695, %v236_v9 }
  0x30   : > { %v244_v14 = vmul.f32 1.442695, %v237_v10  ;;  %v253_v26 = vsel %vm249_vm0, %v234_v7, 0.0  ;;  %v254_v27 = vsel %vm250_vm1, %v235_v8, 0.0  ;;  %v255_v36 = vsel %vm251_vm2, %v236_v9, 0.0  ;;  %p594_p6 = pneg %p593_p5 }
  0x31   : > { %503 = vpow2.f32 %v238_v11  ;;  %v257_v31 = vadd.f32 %v254_v27, %v253_v26  ;;  %v256_v44 = vsel %vm252_vm3, %v237_v10, 0.0 }
  0x32   : > { %505 = vpow2.f32 %v240_v12  ;;  %p599_p13 = pnand %p598_p10, %p594_p6 }
  0x33   : > { %507 = vpow2.f32 %v242_v13  ;;  %v258_v40 = vadd.f32 %v257_v31, %v255_v36 }
  0x34   : > { %509 = vpow2.f32 %v244_v14 }
  0x35   : > { %v259_v47 = vadd.f32 %v258_v40, %v256_v44 }
  0x37   : > { %v504_v15 = vpop.eup %503 }
  0x38   : > { %v506_v16 = vpop.eup %505  ;;  %v260_v23 = vsel %vm249_vm0, %v504_v15, 0.0 }
  0x39   : > { %v508_v17 = vpop.eup %507  ;;  %v246_v18 = vadd.f32 %v506_v16, %v504_v15  ;;  %v261_v24 = vsel %vm250_vm1, %v506_v16, 0.0 }
  0x3a   : > { %v510_v19 = vpop.eup %509  ;;  %v264_v25 = vadd.f32 %v261_v24, %v260_v23  ;;  %v262_v28 = vsel %vm251_vm2, %v508_v17, 0.0 }
  0x3b   : > { %v247_v21 = vadd.f32 %v508_v17, %v246_v18  ;;  %v263_v37 = vsel %vm252_vm3, %v510_v19, 0.0 }
  0x3c   : > { %v265_v32 = vadd.f32 %v264_v25, %v262_v28 }
  0x3d   : > { %v248_v22 = vadd.f32 %v510_v19, %v247_v21 }
  0x3e   : > { %v266_v41 = vadd.f32 %v265_v32, %v263_v37 }
  0x3f   : > { %511 = vrcp.f32 %v248_v22  ;;  %v281_v33 = vand.u32 2147483648, %v248_v22  ;;  %vm275_vm4 = vweird.f32 %v248_v22  ;;  %v279_v35 = vand.u32 2147483647, %v248_v22 }
  0x40   : > { %513 = vlog2.f32 %v248_v22 }
  0x41   : > { %v282_v39 = vor.u32 1.1754944e-38, %v281_v33  ;;  %vm280_vm7 = vcmp.eq.f32.partialorder %v279_v35, 8.507059e+37 }
  0x45   : > { %v512_v29 = vpop.eup %511 }
  0x46   : > { %v271_v30 = vmul.f32 %v512_v29, %v248_v22  ;;  %vm276_vm5 = vweird.f32 %v512_v29  ;;  %v514_v43 = vpop.eup %513 }
  0x47   : > { %vm277_vm6 = vmor %vm275_vm4, %vm276_vm5  ;;  %v268_v48 = vmul.f32 0.6931472, %v514_v43 }
  0x48   : > { %v272_v34 = vsub.f32 1.0, %v271_v30 }
  0x49   : > { %v269_v51 = vsub.f32 %v259_v47, %v268_v48 }
  0x4a   : > { %v273_v38 = vmul.f32 %v512_v29, %v272_v34 }
  0x4c   : > { %v274_v42 = vadd.f32 %v512_v29, %v273_v38 }
  0x4e   : > { %v278_v45 = vsel %vm277_vm6, %v512_v29, %v274_v42 }
  0x4f   : > { %v283_v46 = vsel %vm280_vm7, %v282_v39, %v278_v45 }
  0x50   : > { %v284_v49 = vmul.f32 %v283_v46, %v266_v41 }
  0x52   : > { %v285_v50 = vsub.f32 1.0, %v284_v49 }
  0x54   : > { %v286_v52 = vmul.f32 %v285_v50, %v285_v50 }
  0x56   : > { %v287_v53 = vsub.f32 0.0, %v286_v52 }
  0x58   : > { %v288_v54 = vmul.f32 %v287_v53, %v269_v51 }
  0x5a   : > { %v290_v55 = vsel %vm289_vm8, %v288_v54, 0.0 }
  0x5b   : > { %294 = vst [vmem:[%s220_s20] sm:$0xff] %v290_v55 }
  0x5c   : > { %602 = shalt.err (!%p599_p13)
}
  0x5d   : > { %437 = dma.vmem_to_hbm [thread:$0]  (%p731_p9), %s309_s26, 128, %s311_s19, %s296_s27  }
  0x5e PF: > { %s322_s3 = sand.u32 1, %s641_s9   ;;  %p447_p0 = pnand %p418_p12, %p738_p11 }
  0x5f   : > { %s323_s25 = scalar_lea.sflag [#allocation4], %s322_s3 }
  0x60   : > { %p448_p1 = pneg %p447_p0 }
  0x62   : > { %636 = dma.done.wait (%p448_p1), %s323_s25, 128  }
  0x63   : > { %638 = vsyncadd (%p448_p1), %s323_s25, 4294967168  ;;  %s21_s14 = sadd.s32 1, %s661_s14   ;;  %s834_s9 = smov %s645_s10 }
  0x64   : > { %p18_p2 = scmp.ge.s32.totalorder %s21_s14, 4   ;;  %s835_s10 = smov %s649_s11 }
  0x65   : > { %s836_s11 = smov %s736_s23  ;;  %s837_s12 = smov %s657_s13 }
  0x66   : > { %s838_s13 = smov %s840_s17  ;;  %20 = sbr.rel (!%p18_p2) target bundleno = 8 (0x8), region = 90 }
  0x6b   :  { %329 = vsyncpa [#allocation3], 1 }
  0x6c   :  { %331 = vsyncpa [#allocation3 + $0x1], 1 }
  0x6d   :  { %332 = vsyncpa [#allocation6], 1 }
  0x6e   :  { %334 = vsyncpa [#allocation6 + $0x1], 1 }
  0x6f   :  { %335 = vsyncpa [#allocation4], 1 }
  0x70   :  { %337 = vsyncpa [#allocation4 + $0x1], 1 }

</bundles_post_ra>
